<compile_context>
chip_gen: v7x
topology: tpu7x:2x2x1
jax: 0.10.0
libtpu: 0.0.40
codegen_flags: <defaults>
</compile_context>

<pallas_src>
import numpy as np
import jax
import jax.numpy as jnp
from jax.experimental import pallas as pl
from jax.experimental.pallas import tpu as pltpu

LANE = 128   # vreg lane width
SUB = 8      # vreg sublanes (f32)


def _round_up(x: int, m: int) -> int:
    return -(-x // m) * m


def _kl_kernel(mu_ref, ls_ref, acc_ref):
    s = pl.program_id(1)

    @pl.when(s == 0)
    def _():
        acc_ref[...] = jnp.zeros_like(acc_ref)

    # Cast in-kernel (cheap VPU casts; HBM reads stay at native width).
    mu = mu_ref[...].astype(jnp.float32)          # (rt, LANE)
    ls = ls_ref[...].astype(jnp.float32)          # (rt, LANE)

    # '+1' is deferred to the finalize; padded zeros contribute exactly -1.
    term = ls - mu * mu - jnp.exp(ls)             # exp -> EUP slot

    rt = term.shape[0]
    # Sublane-split reshape keeps every (8,128) tile intact -> VPU-only fold.
    partial = jnp.sum(term.reshape(rt // SUB, SUB, LANE), axis=0)   # (8, LANE)
    acc_ref[...] += partial[None]


def kl_divergence(output, *, use_kernel=None, max_row_tile=1024,
                  min_kernel_elements=32768):
    """Forward of KLDivergence: output is (B, C>=2, D); channels 0/1 are mu/log_std."""
    B, C, D = output.shape
    assert C >= 2, "output must carry at least (mu, log_std) channels"

    mu = output[:, 0, :]
    ls = output[:, 1, :]
    n = B * D

    if use_kernel is None:
        use_kernel = n >= min_kernel_elements
    if not use_kernel:
        # Tiny problems: fused XLA reduction beats the pallas_call fixed cost.
        mu32 = mu.astype(jnp.float32)
        ls32 = ls.astype(jnp.float32)
        return jnp.mean(
            -0.5 * jnp.sum(1.0 + ls32 - mu32 * mu32 - jnp.exp(ls32), axis=1))

    # Flatten (B, D) into one reduction axis; pad once to a whole number of
    # (rt, 128) tiles across a 2-wide parallel split.
    rows_needed = pl.cdiv(n, LANE)
    rt = min(int(max_row_tile), _round_up(rows_needed, SUB))
    rt = _round_up(rt, SUB)
    total_rows = _round_up(rows_needed, 2 * rt)
    steps = total_rows // (2 * rt)
    np_elems = total_rows * LANE

    mu_flat = mu.reshape(-1)
    ls_flat = ls.reshape(-1)
    pad = np_elems - n
    if pad:
        mu_flat = jnp.pad(mu_flat, (0, pad))
        ls_flat = jnp.pad(ls_flat, (0, pad))
    mu2d = mu_flat.reshape(total_rows, LANE)
    ls2d = ls_flat.reshape(total_rows, LANE)

    grid_spec = pltpu.PrefetchScalarGridSpec(
        num_scalar_prefetch=0,
        grid=(2, steps),                                  # (parallel, reduce)
        in_specs=[
            pl.BlockSpec((rt, LANE), lambda c, s: (c * steps + s, 0)),  # mu
            pl.BlockSpec((rt, LANE), lambda c, s: (c * steps + s, 0)),  # log_std
        ],
        # Same block index across s -> output stays resident in VMEM as the
        # per-slice accumulator of per-(sublane,lane) partial sums.
        out_specs=pl.BlockSpec((1, SUB, LANE), lambda c, s: (c, 0, 0)),
    )

    acc = pl.pallas_call(
        _kl_kernel,
        grid_spec=grid_spec,
        out_shape=jax.ShapeDtypeStruct((2, SUB, LANE), jnp.float32),
        compiler_params=pltpu.CompilerParams(
            dimension_semantics=("parallel", "arbitrary"),
            allow_input_fusion=[True, True],
        ),
    )(mu2d, ls2d)

    # Finalize (tiny, plain JAX): undo the deferred '+1' for real elements and
    # the -1 contributed by each padded zero -> add np_elems in one shot, then
    # -0.5 and the batch mean.
    total = jnp.sum(acc)
    return -0.5 * (total + np_elems) / B


if __name__ == "__main__":
    key = jax.random.PRNGKey(0)
    k1, k2 = jax.random.split(key)

    def reference(arr):
        arr = np.asarray(arr)
        mu = arr[:, 0, :].astype(np.float64)
        ls = arr[:, 1, :].astype(np.float64)
        return np.mean(-0.5 * np.sum(1.0 + ls - mu ** 2 - np.exp(ls), axis=1))

    # Case 1: module-default shape. LatentDistribution.Concat -> (B, 3, latentDim=100).
    out_small = jax.random.normal(k1, (2, 3, 100), jnp.float32)
    got_small = jax.block_until_ready(kl_divergence(out_small, use_kernel=True))
    np.testing.assert_allclose(float(got_small), reference(out_small),
                               rtol=1e-4, atol=1e-4)

    # Case 2: D not a multiple of 128 + small row tile -> padding and a
    # multi-step reduction grid get exercised.
    out_big = jax.random.normal(k2, (2, 3, 33000), jnp.float32)
    got_big = jax.block_until_ready(
        kl_divergence(out_big, use_kernel=True, max_row_tile=64))
    np.testing.assert_allclose(float(got_big), reference(out_big),
                               rtol=1e-4, atol=1e-4)

    # Case 3: tiny-problem bypass path (auto).
    got_bypass = jax.block_until_ready(kl_divergence(out_small))
    np.testing.assert_allclose(float(got_bypass), reference(out_small),
                               rtol=1e-4, atol=1e-4)

    print("KERNEL_OK")
</pallas_src>

<mosaic_0001>
module attributes {stable_mosaic.version = 11 : i64} {
  func.func @_kl_kernel(%arg0: i32, %arg1: i32, %arg2: memref<8x128xf32, #tpu.memory_space<vmem>>, %arg3: memref<8x128xf32, #tpu.memory_space<vmem>>, %arg4: memref<1x8x128xf32, #tpu.memory_space<vmem>>) attributes {dimension_semantics = [#tpu.dimension_semantics<parallel>, #tpu.dimension_semantics<arbitrary>], iteration_bounds = array<i64: 2, 1>, scalar_prefetch = 0 : i64, scratch_operands = 0 : i64, tpu.core_type = #tpu.core_type<tc>, window_params = [{transform_indices = @transform_0, window_bounds = array<i64: 8, 128>}, {transform_indices = @transform_1, window_bounds = array<i64: 8, 128>}, {transform_indices = @transform_2, window_bounds = array<i64: 1, 8, 128>}]} {
    %c0_i32 = arith.constant 0 : i32
    %0 = arith.cmpi eq, %arg1, %c0_i32 : i32
    %1 = arith.extui %0 : i1 to i32
    %c0_i32_0 = arith.constant 0 : i32
    %2 = arith.cmpi ne, %1, %c0_i32_0 : i32
    scf.if %2 {
      %cst_10 = arith.constant 0.000000e+00 : f32
      %15 = vector.broadcast %cst_10 : f32 to vector<1x8x128xf32>
      %c0_11 = arith.constant 0 : index
      %c0_12 = arith.constant 0 : index
      %c0_13 = arith.constant 0 : index
      %16 = vector.load %arg4[%c0_11, %c0_12, %c0_13] : memref<1x8x128xf32, #tpu.memory_space<vmem>>, vector<1x8x128xf32>
      tpu.vector_store %arg4[%c0_11, %c0_12, %c0_13], %15 {strides = array<i32>} : memref<1x8x128xf32, #tpu.memory_space<vmem>>, vector<1x8x128xf32>,
    } else {
    }
    %c0 = arith.constant 0 : index
    %c0_1 = arith.constant 0 : index
    %3 = vector.load %arg2[%c0, %c0_1] : memref<8x128xf32, #tpu.memory_space<vmem>>, vector<8x128xf32>
    %c0_2 = arith.constant 0 : index
    %c0_3 = arith.constant 0 : index
    %4 = vector.load %arg3[%c0_2, %c0_3] : memref<8x128xf32, #tpu.memory_space<vmem>>, vector<8x128xf32>
    %5 = arith.mulf %3, %3 : vector<8x128xf32>
    %6 = arith.subf %4, %5 : vector<8x128xf32>
    %7 = math.exp %4 : vector<8x128xf32>
    %8 = arith.subf %6, %7 : vector<8x128xf32>
    %9 = vector.shape_cast %8 : vector<8x128xf32> to vector<1x8x128xf32>
    %cst = arith.constant dense<0.000000e+00> : vector<8x128xf32>
    %10 = vector.multi_reduction <add>, %9, %cst [0] : vector<1x8x128xf32> to vector<8x128xf32>
    %c0_4 = arith.constant 0 : index
    %c0_5 = arith.constant 0 : index
    %c0_6 = arith.constant 0 : index
    %11 = vector.load %arg4[%c0_4, %c0_5, %c0_6] : memref<1x8x128xf32, #tpu.memory_space<vmem>>, vector<1x8x128xf32>
    %12 = vector.shape_cast %10 : vector<8x128xf32> to vector<1x8x128xf32>
    %13 = arith.addf %11, %12 : vector<1x8x128xf32>
    %c0_7 = arith.constant 0 : index
    %c0_8 = arith.constant 0 : index
    %c0_9 = arith.constant 0 : index
    %14 = vector.load %arg4[%c0_7, %c0_8, %c0_9] : memref<1x8x128xf32, #tpu.memory_space<vmem>>, vector<1x8x128xf32>
    tpu.vector_store %arg4[%c0_7, %c0_8, %c0_9], %13 {strides = array<i32>} : memref<1x8x128xf32, #tpu.memory_space<vmem>>, vector<1x8x128xf32>,
    return
  }
  func.func @transform_0(%arg0: i32, %arg1: i32) -> (i32, i32) {
    %c1_i32 = arith.constant 1 : i32
    %0 = arith.muli %arg0, %c1_i32 : i32
    %1 = arith.addi %0, %arg1 : i32
    %c0_i32 = arith.constant 0 : i32
    %c0_i32_0 = arith.constant 0 : i32
    return %1, %c0_i32 : i32, i32
  }
  func.func @transform_1(%arg0: i32, %arg1: i32) -> (i32, i32) {
    %c1_i32 = arith.constant 1 : i32
    %0 = arith.muli %arg0, %c1_i32 : i32
    %1 = arith.addi %0, %arg1 : i32
    %c0_i32 = arith.constant 0 : i32
    %c0_i32_0 = arith.constant 0 : i32
    return %1, %c0_i32 : i32, i32
  }
  func.func @transform_2(%arg0: i32, %arg1: i32) -> (i32, i32, i32) {
    %c0_i32 = arith.constant 0 : i32
    %c0_i32_0 = arith.constant 0 : i32
    %c0_i32_1 = arith.constant 0 : i32
    return %arg0, %c0_i32, %c0_i32_0 : i32, i32, i32
  }
}

</mosaic_0001>

<bundles_post_ra>
// kernel: tpu_custom_call.1
= control target key start
LH: loop header
LB: loop body
LE: loop exit
PB: predicated region body
PF: predicated region fallthrough
CT: control target
= control target key end

     0   :  { %7 = vsyncpa [#allocation3], 0  ;;  %s821_s0 = inlined_call_operand.hbm [shape: f32[16,128], index: 0, kind: input, shape index: {}]   ;;  %s822_s1 = inlined_call_operand.hbm [shape: f32[16,128], index: 1, kind: input, shape index: {}]   ;;  %s823_s2 = inlined_call_operand.hbm [shape: f32[2,8,128], index: 2, kind: output, shape index: {}]  }
   0x1   :  { %9 = vsyncpa [#allocation3 + $0x1], 0 }
   0x2   :  { %10 = vsyncpa [#allocation6], 0 }
   0x3   :  { %12 = vsyncpa [#allocation6 + $0x1], 0 }
   0x4   :  { %13 = vsyncpa [#allocation4], 0 }
   0x5   :  { %15 = vsyncpa [#allocation4 + $0x1], 0  ;;  %s601_s9 = smov 0   ;;  %s603_s10 = smov 0  }
   0x6   :  { %s605_s11 = smov 0   ;;  %s607_s12 = smov 0  }
   0x7   :  { %s609_s13 = smov 0   ;;  %s611_s14 = smov 0  }
   0x8 LB: > { %s349_s15 = sadd.s32 4294967295, %s581_s14   ;;  %s350_s16 = sadd.s32 4294967294, %s581_s14   ;;  %s581_s14 = sphi %s611_s14, %s21_s14   ;;  %s577_s13 = sphi %s609_s13, %s843_s13   ;;  %s573_s12 = sphi %s607_s12, %s842_s12   ;;  %s569_s11 = sphi %s605_s11, %s841_s11   ;;  %s565_s10 = sphi %s603_s10, %s840_s10   ;;  %s561_s9 = sphi %s601_s9, %s839_s9  }
   0x9   : > { %s33_s17 = sadd.s32 1, %s577_s13  ;;  %s42_s18 = sadd.s32 1, %s569_s11 }
   0xa   : > { %p35_p0 = scmp.ge.s32.totalorder %s33_s17, 2  ;;  %p49_p1 = scmp.ne.s32.totalorder %s569_s11, %s565_s10 }
   0xb   : > { %p50_p2 = scmp.eq.s32.totalorder %s581_s14, 0  ;;  %p55_p3 = scmp.ne.s32.totalorder %s565_s10, %s561_s9 }
   0xc   : > { %s845_s17 = smov (%p35_p0, %s33_s17), 0  ;;  %p56_p5 = scmp.eq.s32.totalorder %s349_s15, 0 }
   0xd   : > { %p642_p4 = por %p50_p2, %p49_p1  ;;  %s39_s20 = ssub.s32 %s577_s13, %s845_s17 }
   0xe   : > { %p107_p6 = scmp.eq.s32.totalorder %s349_s15, 1  ;;  %p40_p7 = scmp.eq.s32.totalorder %s39_s20, 0 }
   0xf   : > { %p648_p8 = por %p56_p5, %p55_p3  ;;  %p113_p10 = scmp.eq.s32.totalorder %s350_s16, 1 }
  0x10   : > { %p652_p9 = por %p107_p6, %p49_p1  ;;  %p382_p13 = scmp.lt.s32.totalorder %s581_s14, 2 }
  0x11   : > { %s827_s21 = scalar_select %p648_p8, 1, 0 }
  0x12   : > { %s828_s22 = scalar_select %p652_p9, 1, 0 }
  0x13   : > { %s657_s23 = scalar_select %p40_p7, %s569_s11, %s42_s18  }
  0x14   : > { %p659_p11 = por %p113_p10, %p55_p3  ;;  %s666_s25 = sand.u32 1, %s569_s11  }
  0x15   : > { %s353_s26 = sshll.u32 %s666_s25, 3  ;;  %s354_s27 = sshll.u32 %s577_s13, 7 }
  0x16   : > { %s829_s24 = scalar_select %p659_p11, 1, 0 }
  0x17   : > { %s675_s30 = scalar_lea.hbm %s821_s0, %s354_s27  ;;  %s137_s3 = scalar_lea.vmem [#allocation2], %s353_s26 }
  0x18   : > { %s145_s4 = sshll.u32 %s137_s3, 4  ;;  %p683_p0 = pnand %p382_p13, %p642_p4  ;;  %s679_s4 = int_to_ptr.vmem [resolvable:$true] %s145_s4 }
  0x19   : > { %s134_s6 = scalar_lea.sflag [#allocation3], %s666_s25  ;;  %s435_s7 = scalar_lea.hbm %s675_s30, 128 }
  0x1a   : > { %p436_p3 = scmp.ne.s32.totalorder %s675_s30, %s435_s7  ;;  %p437_p5 = pneg %p683_p0 }
  0x1b   : > { %s440_s16 = scalar_lea.hbm %s821_s0, 256  ;;  %p441_p4 = scmp.lt.u32.totalorder %s675_s30, %s821_s0 }
  0x1c   : > { %p438_p6 = pnand %p437_p5, %p436_p3  ;;  %p442_p10 = scmp.lt.u32.totalorder %s440_s16, %s435_s7 }
  0x1d   : > { %p444_p12 = scmp.lt.u32.totalorder %s435_s7, %s675_s30 }
  0x1e   : > { %p439_p7 = pneg %p438_p6  ;;  %p443_p13 = por %p442_p10, %p441_p4 }
  0x20   : > { %p445_p1 = por %p444_p12, %p443_p13 }
  0x22   : > { %p446_p2 = pnand %p445_p1, %p439_p7 }
  0x24   : > { %449 = shalt.err (!%p446_p2)
}
  0x25   : > { %s450_s20 = scalar_lea.vmem %s679_s4, 128  ;;  %s583_s28 = smov [#allocation2]  }
  0x26   : > { %p451_p3 = scmp.ne.s32.totalorder %s679_s4, %s450_s20  ;;  %s455_s29 = sshll.u32 %s583_s28, 4  ;;  %s456_s29 = int_to_ptr.vmem [resolvable:$false] %s455_s29 }
  0x27   : > { %s457_s3 = scalar_lea.vmem %s456_s29, 256  ;;  %p458_p9 = scmp.lt.s32.totalorder %s679_s4, %s456_s29 }
  0x28   : > { %p453_p6 = pnand %p451_p3, %p437_p5  ;;  %p459_p4 = scmp.lt.s32.totalorder %s457_s3, %s450_s20 }
  0x2a   : > { %p454_p11 = pneg %p453_p6  ;;  %p460_p10 = por %p459_p4, %p458_p9 }
  0x2c   : > { %p461_p12 = pnand %p460_p10, %p454_p11 }
  0x2e   : > { %464 = shalt.err (!%p461_p12)
}
  0x2f   : > { %374 = dma.hbm_to_vmem [thread:$0]  (!%p683_p0), %s675_s30, 128, %s679_s4, %s134_s6  }
  0x30   : > { %p831_p1 = scmp.lt.s32.totalorder %s581_s14, 3  ;;  %p832_p2 = scmp.ge.s32.totalorder %s581_s14, 1 }
  0x31   : > { %s728_s16 = scalar_lea.hbm %s822_s1, %s354_s27  ;;  %s156_s18 = scalar_lea.vmem [#allocation5], %s353_s26 }
  0x32   : > { %p719_p7 = pnand %p832_p2, %p831_p1  ;;  %s164_s19 = sshll.u32 %s156_s18, 4  ;;  %s165_s19 = int_to_ptr.vmem [resolvable:$true] %s164_s19 }
  0x33   : > { %s153_s30 = scalar_lea.sflag [#allocation6], %s666_s25  ;;  %s465_s4 = scalar_lea.hbm %s728_s16, 128 }
  0x34   : > { %s833_s7 = scalar_select %p719_p7, 1, 0 }
  0x35   : > { %p466_p9 = scmp.ne.s32.totalorder %s728_s16, %s465_s4  ;;  %s470_s27 = scalar_lea.hbm %s822_s1, 256 }
  0x36   : > { %p471_p3 = scmp.lt.u32.totalorder %s728_s16, %s822_s1  ;;  %p472_p6 = scmp.lt.u32.totalorder %s470_s27, %s465_s4 }
  0x37   : > { %p468_p11 = pnand %p466_p9, %p437_p5  ;;  %p474_p10 = scmp.lt.u32.totalorder %s465_s4, %s728_s16 }
  0x38   : > { %p473_p4 = por %p472_p6, %p471_p3 }
  0x39   : > { %p469_p13 = pneg %p468_p11 }
  0x3a   : > { %p475_p12 = por %p474_p10, %p473_p4 }
  0x3c   : > { %p476_p1 = pnand %p475_p12, %p469_p13 }
  0x3e   : > { %479 = shalt.err (!%p476_p1)
}
  0x3f   : > { %s480_s25 = scalar_lea.vmem %s165_s19, 128  ;;  %s584_s26 = smov [#allocation5]  }
  0x40   : > { %p481_p2 = scmp.ne.s32.totalorder %s165_s19, %s480_s25  ;;  %s485_s3 = sshll.u32 %s584_s26, 4  ;;  %s486_s3 = int_to_ptr.vmem [resolvable:$false] %s485_s3 }
  0x41   : > { %s487_s8 = scalar_lea.vmem %s486_s3, 256  ;;  %p488_p8 = scmp.lt.s32.totalorder %s165_s19, %s486_s3 }
  0x42   : > { %p483_p9 = pnand %p481_p2, %p437_p5  ;;  %p489_p7 = scmp.lt.s32.totalorder %s487_s8, %s480_s25 }
  0x44   : > { %p484_p11 = pneg %p483_p9  ;;  %p490_p3 = por %p489_p7, %p488_p8 }
  0x46   : > { %p491_p6 = pnand %p490_p3, %p484_p11 }
  0x48   : > { %494 = shalt.err (!%p491_p6)
}
  0x49   : > { %377 = dma.hbm_to_vmem [thread:$0]  (!%p683_p0), %s728_s16, 128, %s165_s19, %s153_s30  }
  0x4a   : > { %p834_p13 = scmp.ne.s32.totalorder %s833_s7, 0 }
  0x4b   : > { %s755_s15 = sand.u32 (!%p834_p13), 1, %s565_s10   ;;  %p835_p5 = scmp.ne.s32.totalorder (!%p834_p13), %s827_s21, 0 }
  0x4c   : > { %173 = sbr.rel (%p834_p13) target bundleno = 116 (0x74), region = 28  ;;  %s358_s18 = sshll.u32 (!%p834_p13), %s755_s15, 3 }
  0x4d   : > { %s176_s4 = scalar_lea.sflag (!%p834_p13), [#allocation3], %s755_s15  ;;  %s179_s6 = scalar_lea.vmem (!%p834_p13), [#allocation2], %s358_s18 }
  0x53   : > { %548 = dma.done.wait (%p835_p5), %s176_s4, 128  }
  0x54   : > { %550 = vsyncadd (%p835_p5), %s176_s4, 4294967168  ;;  %s185_s5 = scalar_lea.sflag [#allocation6], %s755_s15  ;;  %s188_s16 = scalar_lea.vmem [#allocation5], %s358_s18 }
  0x55   : > { %552 = dma.done.wait (%p835_p5), %s185_s5, 128  }
  0x56   : > { %554 = vsyncadd (%p835_p5), %s185_s5, 4294967168  ;;  %v222_v0 = vld [vmem:[%s188_s16] sm:$0xff]  ;;  %v221_v2 = vld [vmem:[%s179_s6] sm:$0xff]  ;;  %s362_s7 = sshll.u32 %s573_s12, 7  ;;  %s213_s19 = scalar_lea.vmem [#allocation7], %s358_s18 }
  0x57   : > { %v225_v1 = vmul.f32 1.442695, %v222_v0  ;;  %v223_v3 = vmul.f32 %v221_v2, %v221_v2  ;;  %s246_s30 = sshll.u32 %s213_s19, 4  ;;  %s772_s28 = scalar_lea.hbm %s823_s2, %s362_s7  ;;  %s774_s30 = int_to_ptr.vmem [resolvable:$true] %s246_s30 }
  0x58   : > { %s233_s21 = scalar_lea.sflag [#allocation4], %s755_s15  ;;  %s495_s29 = scalar_lea.vmem %s774_s30, 128 }
  0x59   : > { %433 = vpow2.f32 %v225_v1  ;;  %v224_v4 = vsub.f32 %v222_v0, %v223_v3  ;;  %p496_p8 = scmp.ne.s32.totalorder %s774_s30, %s495_s29  ;;  %p836_p0 = scmp.ne.s32.totalorder %s828_s22, 0 }
  0x5a   : > { %s585_s12 = smov [#allocation7]  }
  0x5b   : > { %p497_p7 = pnand %p496_p8, %p836_p0  ;;  %s499_s25 = sshll.u32 %s585_s12, 4  ;;  %s500_s25 = int_to_ptr.vmem [resolvable:$false] %s499_s25 }
  0x5c   : > { %s501_s26 = scalar_lea.vmem %s500_s25, 256  ;;  %p502_p10 = scmp.lt.s32.totalorder %s774_s30, %s500_s25 }
  0x5d   : > { %p498_p4 = pneg %p497_p7  ;;  %p503_p12 = scmp.lt.s32.totalorder %s501_s26, %s495_s29 }
  0x5f   : > { %p504_p1 = por %p503_p12, %p502_p10 }
  0x61   : > { %p505_p2 = pnand %p504_p1, %p498_p4 }
  0x63   : > { %v434_v5 = vpop.eup %433 }
  0x64   : > { %v227_v6 = vsub.f32 %v224_v4, %v434_v5 }
  0x66   : > { %231 = vst [vmem:[%s213_s19] sm:$0xff] %v227_v6 }
  0x67   : > { %508 = shalt.err (!%p505_p2)
}
  0x68   : > { %s509_s3 = scalar_lea.hbm %s772_s28, 128  ;;  %s513_s18 = scalar_lea.hbm %s823_s2, 256 }
  0x69   : > { %p510_p9 = scmp.ne.s32.totalorder %s772_s28, %s509_s3  ;;  %p514_p6 = scmp.lt.u32.totalorder %s772_s28, %s823_s2 }
  0x6a   : > { %p515_p13 = scmp.lt.u32.totalorder %s513_s18, %s509_s3  ;;  %p517_p8 = scmp.lt.u32.totalorder %s509_s3, %s772_s28 }
  0x6b   : > { %p511_p11 = pnand %p510_p9, %p836_p0 }
  0x6c   : > { %p516_p5 = por %p515_p13, %p514_p6 }
  0x6d   : > { %p512_p3 = pneg %p511_p11 }
  0x6e   : > { %p518_p7 = por %p517_p8, %p516_p5 }
  0x70   : > { %p519_p4 = pnand %p518_p7, %p512_p3 }
  0x72   : > { %522 = shalt.err (!%p519_p4)
}
  0x73   : > { %369 = dma.vmem_to_hbm [thread:$0]  (%p836_p0), %s774_s30, 128, %s772_s28, %s233_s21  }
  0x74 PF: > { %s258_s5 = sand.u32 1, %s561_s9   ;;  %p837_p10 = scmp.ne.s32.totalorder %s829_s24, 0 }
  0x75   : > { %p838_p12 = scmp.ge.s32.totalorder %s581_s14, 2  ;;  %s259_s16 = scalar_lea.sflag [#allocation4], %s258_s5 }
  0x77   : > { %p379_p1 = pnand %p838_p12, %p837_p10 }
  0x79   : > { %556 = dma.done.wait (!%p379_p1), %s259_s16, 128  }
  0x7a   : > { %558 = vsyncadd (!%p379_p1), %s259_s16, 4294967168  ;;  %s21_s14 = sadd.s32 1, %s581_s14   ;;  %s839_s9 = smov %s565_s10 }
  0x7b   : > { %p18_p2 = scmp.ge.s32.totalorder %s21_s14, 4   ;;  %s840_s10 = smov %s569_s11 }
  0x7c   : > { %s841_s11 = smov %s657_s23  ;;  %s842_s12 = smov %s577_s13 }
  0x7d   : > { %s843_s13 = smov %s845_s17  ;;  %20 = sbr.rel (!%p18_p2) target bundleno = 8 (0x8), region = 90 }
  0x84   :  { %264 = vsyncpa [#allocation3], 1 }
  0x85   :  { %266 = vsyncpa [#allocation3 + $0x1], 1 }
  0x86   :  { %267 = vsyncpa [#allocation6], 1 }
  0x87   :  { %269 = vsyncpa [#allocation6 + $0x1], 1 }
  0x88   :  { %270 = vsyncpa [#allocation4], 1 }
  0x89   :  { %272 = vsyncpa [#allocation4 + $0x1], 1 }

</bundles_post_ra>
